<compile_context>
chip_gen: v7x
topology: tpu7x:2x2x1
jax: 0.10.0
libtpu: 0.0.40
codegen_flags: <defaults>
</compile_context>

<pallas_src>
import jax
import jax.numpy as jnp
from jax.experimental import pallas as pl
from jax.experimental.pallas import tpu as pltpu

HIDDEN = 64  # config['hidden_size']


def _round_up(x, m):
    return ((x + m - 1) // m) * m


def actor_kernel(x_ref, w1_ref, b1_ref, w2_ref, b2_ref, w3_ref, b3_ref, o_ref):
    # fc1 + ReLU: bf16 x bf16 on the MXU, f32 accumulate, f32 bias/ReLU.
    x = x_ref[...].astype(jnp.bfloat16)
    h1 = jnp.dot(x, w1_ref[...], preferred_element_type=jnp.float32)
    h1 = jnp.maximum(h1 + b1_ref[...], 0.0)
    # fc2 + ReLU (64x64, MXU).
    h2 = jnp.dot(h1.astype(jnp.bfloat16), w2_ref[...],
                 preferred_element_type=jnp.float32)
    h2 = jnp.maximum(h2 + b2_ref[...], 0.0)
    # fc3 logits + softmax over the action dimension (last axis), in f32.
    logits = jnp.dot(h2.astype(jnp.bfloat16), w3_ref[...],
                     preferred_element_type=jnp.float32)
    logits = logits + b3_ref[...]
    m = jnp.max(logits, axis=-1, keepdims=True)
    e = jnp.exp(logits - m)
    inv = pl.reciprocal(jnp.sum(e, axis=-1, keepdims=True), approx=False)
    o_ref[...] = (e * inv).astype(o_ref.dtype)


def actor_forward(x, params, *, block_rows=4096):
    """x: (B, state_dim) f32; params: dict of pre-transposed f32 weights/biases.

    Returns (B, action_dim) softmax probabilities (f32).
    """
    B, state_dim = x.shape
    action_dim = params["w3"].shape[1]

    # Weights go to the kernel as bf16 (single-pass MXU); biases stay f32 and
    # all bias/ReLU/softmax math is f32. The casts below touch ~10 KiB total.
    w1 = params["w1"].astype(jnp.bfloat16)
    w2 = params["w2"].astype(jnp.bfloat16)
    w3 = params["w3"].astype(jnp.bfloat16)
    b1, b2, b3 = params["b1"], params["b2"], params["b3"]

    # Batch tile: multiple of 8 sublanes, capped at block_rows. The grid uses
    # cdiv so a non-dividing B just gives a partial last tile (no pad/slice
    # HBM copies in the wrapper).
    tb = min(_round_up(block_rows, 8), _round_up(B, 8))
    grid = (pl.cdiv(B, tb),)

    return pl.pallas_call(
        actor_kernel,
        out_shape=jax.ShapeDtypeStruct((B, action_dim), jnp.float32),
        grid_spec=pltpu.PrefetchScalarGridSpec(
            num_scalar_prefetch=0,
            grid=grid,
            in_specs=[
                # x: streamed per batch tile.
                # TODO(synk): pipeline_mode=pl.Buffered(3) here if xprof shows
                # exposed DMA latency on these small lane-padded tiles.
                pl.BlockSpec((tb, state_dim), lambda i: (i, 0)),
                # parameters: constant block index -> pinned in VMEM.
                pl.BlockSpec((state_dim, HIDDEN), lambda i: (0, 0)),
                pl.BlockSpec((1, HIDDEN), lambda i: (0, 0)),
                pl.BlockSpec((HIDDEN, HIDDEN), lambda i: (0, 0)),
                pl.BlockSpec((1, HIDDEN), lambda i: (0, 0)),
                pl.BlockSpec((HIDDEN, action_dim), lambda i: (0, 0)),
                pl.BlockSpec((1, action_dim), lambda i: (0, 0)),
            ],
            out_specs=pl.BlockSpec((tb, action_dim), lambda i: (i, 0)),
        ),
        compiler_params=pltpu.CompilerParams(
            dimension_semantics=("parallel",),
        ),
    )(x, w1, b1, w2, b2, w3, b3)


def init_params(key, state_dim, action_dim):
    """Deterministic synthetic parameters (PyTorch nn.Linear-style uniform init)."""
    ks = jax.random.split(key, 6)

    def linear(kw, kb, fan_in, fan_out):
        bound = 1.0 / jnp.sqrt(fan_in)
        # stored as (in, out) = W_pytorch.T
        w = jax.random.uniform(kw, (fan_in, fan_out), jnp.float32, -bound, bound)
        b = jax.random.uniform(kb, (1, fan_out), jnp.float32, -bound, bound)
        return w, b

    w1, b1 = linear(ks[0], ks[1], state_dim, HIDDEN)
    w2, b2 = linear(ks[2], ks[3], HIDDEN, HIDDEN)
    w3, b3 = linear(ks[4], ks[5], HIDDEN, action_dim)
    return {"w1": w1, "b1": b1, "w2": w2, "b2": b2, "w3": w3, "b3": b3}


def actor_reference(x, p, *, bf16_matmul=True):
    """Pure-JAX reference. bf16_matmul=True mirrors the kernel's MXU dtypes."""
    def dot(a, w):
        if bf16_matmul:
            a = a.astype(jnp.bfloat16)
            w = w.astype(jnp.bfloat16)
        return jnp.dot(a, w, preferred_element_type=jnp.float32)

    h1 = jnp.maximum(dot(x, p["w1"]) + p["b1"], 0.0)
    h2 = jnp.maximum(dot(h1, p["w2"]) + p["b2"], 0.0)
    logits = dot(h2, p["w3"]) + p["b3"]
    return jax.nn.softmax(logits, axis=-1)


if __name__ == "__main__":
    key = jax.random.PRNGKey(0)
    k_param, k_x1, k_x2 = jax.random.split(key, 3)

    batch, state_dim, action_dim = 8, 4, 2  # CartPole-style actor
    params = init_params(k_param, state_dim, action_dim)

    # Small single-tile case.
    x = jax.random.normal(k_x1, (batch, state_dim), jnp.float32)
    out = jax.block_until_ready(actor_forward(x, params))
    assert out.shape == (batch, action_dim)
    ref_bf16 = actor_reference(x, params, bf16_matmul=True)
    ref_f32 = actor_reference(x, params, bf16_matmul=False)
    assert jnp.allclose(out, ref_bf16, atol=1e-4, rtol=1e-4)
    assert jnp.allclose(out, ref_f32, atol=3e-2, rtol=3e-2)
    # Probabilities sum to 1 per row.
    assert jnp.allclose(jnp.sum(out, axis=-1), 1.0, atol=1e-5)

    # Multi-step grid with a partial last tile (40 = 2*16 + 8): exercises the
    # pad-free cdiv grid path and masked boundary writeback.
    x2 = jax.random.normal(k_x2, (40, state_dim), jnp.float32)
    out2 = jax.block_until_ready(actor_forward(x2, params, block_rows=16))
    assert out2.shape == (40, action_dim)
    ref2 = actor_reference(x2, params, bf16_matmul=True)
    assert jnp.allclose(out2, ref2, atol=1e-4, rtol=1e-4)
    assert jnp.allclose(jnp.sum(out2, axis=-1), 1.0, atol=1e-5)

    print("KERNEL_OK")
</pallas_src>

<mosaic_0001>
module attributes {stable_mosaic.version = 11 : i64} {
  func.func @actor_kernel(%arg0: i32, %arg1: memref<8x4xf32, #tpu.memory_space<vmem>>, %arg2: memref<4x64xbf16, #tpu.memory_space<vmem>>, %arg3: memref<1x64xf32, #tpu.memory_space<vmem>>, %arg4: memref<64x64xbf16, #tpu.memory_space<vmem>>, %arg5: memref<1x64xf32, #tpu.memory_space<vmem>>, %arg6: memref<64x2xbf16, #tpu.memory_space<vmem>>, %arg7: memref<1x2xf32, #tpu.memory_space<vmem>>, %arg8: memref<8x2xf32, #tpu.memory_space<vmem>>) attributes {dimension_semantics = [#tpu.dimension_semantics<parallel>], iteration_bounds = array<i64: 1>, scalar_prefetch = 0 : i64, scratch_operands = 0 : i64, tpu.core_type = #tpu.core_type<tc>, window_params = [{transform_indices = @transform_0, window_bounds = array<i64: 8, 4>}, {pipeline_mode = #tpu.pipeline_mode<synchronous>, transform_indices = @transform_1, window_bounds = array<i64: 4, 64>}, {pipeline_mode = #tpu.pipeline_mode<synchronous>, transform_indices = @transform_2, window_bounds = array<i64: 1, 64>}, {pipeline_mode = #tpu.pipeline_mode<synchronous>, transform_indices = @transform_3, window_bounds = array<i64: 64, 64>}, {pipeline_mode = #tpu.pipeline_mode<synchronous>, transform_indices = @transform_4, window_bounds = array<i64: 1, 64>}, {pipeline_mode = #tpu.pipeline_mode<synchronous>, transform_indices = @transform_5, window_bounds = array<i64: 64, 2>}, {pipeline_mode = #tpu.pipeline_mode<synchronous>, transform_indices = @transform_6, window_bounds = array<i64: 1, 2>}, {transform_indices = @transform_7, window_bounds = array<i64: 8, 2>}]} {
    %c0 = arith.constant 0 : index
    %c0_0 = arith.constant 0 : index
    %0 = vector.load %arg1[%c0, %c0_0] : memref<8x4xf32, #tpu.memory_space<vmem>>, vector<8x4xf32>
    %1 = arith.truncf %0 : vector<8x4xf32> to vector<8x4xbf16>
    %c0_1 = arith.constant 0 : index
    %c0_2 = arith.constant 0 : index
    %2 = vector.load %arg2[%c0_1, %c0_2] : memref<4x64xbf16, #tpu.memory_space<vmem>>, vector<4x64xbf16>
    %cst = arith.constant dense<0.000000e+00> : vector<8x64xf32>
    %3 = tpu.matmul %1, %2, %cst {dimension_numbers = #tpu.dot_dimension_numbers<[1], [0], [0], [1], [0, 0, 1, 1], [], []>} : vector<8x4xbf16>, vector<4x64xbf16>, vector<8x64xf32> -> vector<8x64xf32>
    %c0_3 = arith.constant 0 : index
    %c0_4 = arith.constant 0 : index
    %4 = vector.load %arg3[%c0_3, %c0_4] : memref<1x64xf32, #tpu.memory_space<vmem>>, vector<1x64xf32>
    %5 = vector.broadcast %4 : vector<1x64xf32> to vector<8x64xf32>
    %6 = arith.addf %3, %5 : vector<8x64xf32>
    %cst_5 = arith.constant 0.000000e+00 : f32
    %7 = vector.broadcast %cst_5 : f32 to vector<8x64xf32>
    %8 = arith.maximumf %6, %7 : vector<8x64xf32>
    %9 = arith.truncf %8 : vector<8x64xf32> to vector<8x64xbf16>
    %c0_6 = arith.constant 0 : index
    %c0_7 = arith.constant 0 : index
    %10 = vector.load %arg4[%c0_6, %c0_7] : memref<64x64xbf16, #tpu.memory_space<vmem>>, vector<64x64xbf16>
    %cst_8 = arith.constant dense<0.000000e+00> : vector<8x64xf32>
    %11 = tpu.matmul %9, %10, %cst_8 {dimension_numbers = #tpu.dot_dimension_numbers<[1], [0], [0], [1], [0, 0, 1, 1], [], []>} : vector<8x64xbf16>, vector<64x64xbf16>, vector<8x64xf32> -> vector<8x64xf32>
    %c0_9 = arith.constant 0 : index
    %c0_10 = arith.constant 0 : index
    %12 = vector.load %arg5[%c0_9, %c0_10] : memref<1x64xf32, #tpu.memory_space<vmem>>, vector<1x64xf32>
    %13 = vector.broadcast %12 : vector<1x64xf32> to vector<8x64xf32>
    %14 = arith.addf %11, %13 : vector<8x64xf32>
    %cst_11 = arith.constant 0.000000e+00 : f32
    %15 = vector.broadcast %cst_11 : f32 to vector<8x64xf32>
    %16 = arith.maximumf %14, %15 : vector<8x64xf32>
    %17 = arith.truncf %16 : vector<8x64xf32> to vector<8x64xbf16>
    %c0_12 = arith.constant 0 : index
    %c0_13 = arith.constant 0 : index
    %18 = vector.load %arg6[%c0_12, %c0_13] : memref<64x2xbf16, #tpu.memory_space<vmem>>, vector<64x2xbf16>
    %cst_14 = arith.constant dense<0.000000e+00> : vector<8x2xf32>
    %19 = tpu.matmul %17, %18, %cst_14 {dimension_numbers = #tpu.dot_dimension_numbers<[1], [0], [0], [1], [0, 0, 1, 1], [], []>} : vector<8x64xbf16>, vector<64x2xbf16>, vector<8x2xf32> -> vector<8x2xf32>
    %c0_15 = arith.constant 0 : index
    %c0_16 = arith.constant 0 : index
    %20 = vector.load %arg7[%c0_15, %c0_16] : memref<1x2xf32, #tpu.memory_space<vmem>>, vector<1x2xf32>
    %21 = vector.broadcast %20 : vector<1x2xf32> to vector<8x2xf32>
    %22 = arith.addf %19, %21 : vector<8x2xf32>
    %cst_17 = arith.constant dense<0xFF800000> : vector<8xf32>
    %23 = vector.multi_reduction <maximumf>, %22, %cst_17 [1] : vector<8x2xf32> to vector<8xf32>
    %24 = vector.shape_cast %23 : vector<8xf32> to vector<8x1xf32>
    %25 = vector.broadcast %24 : vector<8x1xf32> to vector<8x2xf32>
    %26 = arith.subf %22, %25 : vector<8x2xf32>
    %27 = math.exp %26 : vector<8x2xf32>
    %cst_18 = arith.constant dense<0.000000e+00> : vector<8xf32>
    %28 = vector.multi_reduction <add>, %27, %cst_18 [1] : vector<8x2xf32> to vector<8xf32>
    %29 = vector.shape_cast %28 : vector<8xf32> to vector<8x1xf32>
    %30 = tpu.reciprocal %29 : vector<8x1xf32> -> vector<8x1xf32>
    %31 = vector.broadcast %30 : vector<8x1xf32> to vector<8x2xf32>
    %32 = arith.mulf %27, %31 : vector<8x2xf32>
    %c0_19 = arith.constant 0 : index
    %c0_20 = arith.constant 0 : index
    %33 = vector.load %arg8[%c0_19, %c0_20] : memref<8x2xf32, #tpu.memory_space<vmem>>, vector<8x2xf32>
    tpu.vector_store %arg8[%c0_19, %c0_20], %32 {strides = array<i32>} : memref<8x2xf32, #tpu.memory_space<vmem>>, vector<8x2xf32>,
    return
  }
  func.func @transform_0(%arg0: i32) -> (i32, i32) {
    %c0_i32 = arith.constant 0 : i32
    %c0_i32_0 = arith.constant 0 : i32
    return %arg0, %c0_i32 : i32, i32
  }
  func.func @transform_1(%arg0: i32) -> (i32, i32) {
    %c0_i32 = arith.constant 0 : i32
    %c0_i32_0 = arith.constant 0 : i32
    %c0_i32_1 = arith.constant 0 : i32
    return %c0_i32, %c0_i32_0 : i32, i32
  }
  func.func @transform_2(%arg0: i32) -> (i32, i32) {
    %c0_i32 = arith.constant 0 : i32
    %c0_i32_0 = arith.constant 0 : i32
    %c0_i32_1 = arith.constant 0 : i32
    return %c0_i32, %c0_i32_0 : i32, i32
  }
  func.func @transform_3(%arg0: i32) -> (i32, i32) {
    %c0_i32 = arith.constant 0 : i32
    %c0_i32_0 = arith.constant 0 : i32
    %c0_i32_1 = arith.constant 0 : i32
    return %c0_i32, %c0_i32_0 : i32, i32
  }
  func.func @transform_4(%arg0: i32) -> (i32, i32) {
    %c0_i32 = arith.constant 0 : i32
    %c0_i32_0 = arith.constant 0 : i32
    %c0_i32_1 = arith.constant 0 : i32
    return %c0_i32, %c0_i32_0 : i32, i32
  }
  func.func @transform_5(%arg0: i32) -> (i32, i32) {
    %c0_i32 = arith.constant 0 : i32
    %c0_i32_0 = arith.constant 0 : i32
    %c0_i32_1 = arith.constant 0 : i32
    return %c0_i32, %c0_i32_0 : i32, i32
  }
  func.func @transform_6(%arg0: i32) -> (i32, i32) {
    %c0_i32 = arith.constant 0 : i32
    %c0_i32_0 = arith.constant 0 : i32
    %c0_i32_1 = arith.constant 0 : i32
    return %c0_i32, %c0_i32_0 : i32, i32
  }
  func.func @transform_7(%arg0: i32) -> (i32, i32) {
    %c0_i32 = arith.constant 0 : i32
    %c0_i32_0 = arith.constant 0 : i32
    return %arg0, %c0_i32 : i32, i32
  }
}

</mosaic_0001>

<bundles_post_ra>
// kernel: tpu_custom_call.1
= control target key start
LH: loop header
LB: loop body
LE: loop exit
PB: predicated region body
PF: predicated region fallthrough
CT: control target
= control target key end

     0   :  { %vm41_vm0 = vcmask 1041408   ;;  %v341_v0 = vmov 0.0   ;;  %vm342_vm1 = vmmov 0   ;;  %vm37_vm2 = vcmask 31744   ;;  %s430_s1 = inlined_call_operand.vmem [shape: bf16[4,64], index: 1, kind: input, shape index: {}]   ;;  %s431_s0 = inlined_call_operand.vmem [shape: f32[8,4], index: 0, kind: input, shape index: {}]   ;;  %s432_s3 = inlined_call_operand.vmem [shape: bf16[64,64], index: 3, kind: input, shape index: {}]   ;;  %s433_s5 = inlined_call_operand.vmem [shape: bf16[64,2], index: 5, kind: input, shape index: {}]   ;;  %s434_s2 = inlined_call_operand.vmem [shape: f32[1,64], index: 2, kind: input, shape index: {}]   ;;  %s435_s4 = inlined_call_operand.vmem [shape: f32[1,64], index: 4, kind: input, shape index: {}]   ;;  %s436_s6 = inlined_call_operand.vmem [shape: f32[1,2], index: 6, kind: input, shape index: {}]   ;;  %s437_s7 = inlined_call_operand.vmem [shape: f32[8,2], index: 7, kind: output, shape index: {}]  }
   0x1   :  { %297 = vmatprep.subr.bf16.mxu0 %v341_v0  ;;  %v29_v1 = vld [vmem:[%s430_s1] sm:$0x3]  ;;  %299 = vmatprep.mubr.msk.bf16.mxu0 %vm342_vm1, %v341_v0  ;;  %v330_v6 = vld [vmem:[%s432_s3 + $0x8] sm:$0xff]   ;;  %v331_v7 = vld [vmem:[%s432_s3 + $0x10] sm:$0xff]   ;;  %vm126_vm3 = vcmask 523264   ;;  %vm254_vm4 = vcmask 15360  }
   0x2   :  { %v27_v2 = vld [vmem:[%s431_s0] sm:$0xff]  ;;  %v43_v3 = vsel %vm41_vm0, %v29_v1, 0  ;;  %303 = vmatprep.subr.bf16.mxu1 %v341_v0  ;;  %311 = vmatprep.mubr.msk.bf16.mxu1 %vm342_vm1, %v341_v0  ;;  %v332_v8 = vld [vmem:[%s432_s3 + $0x18] sm:$0xff]   ;;  %v334_v10 = vld [vmem:[%s433_s5 + $0x8] sm:$0xff]  }
   0x3   :  { %v28_v4 = vpack.c.bf16 %v27_v2, %v27_v2  ;;  %v329_v5 = vld [vmem:[%s432_s3] sm:$0xff]   ;;  %298 = vmatpush3.bf16.msra.mxu0 %v43_v3  ;;  %v335_v19 = vld [vmem:[%s433_s5 + $0x10] sm:$0xff]   ;;  %v336_v20 = vld [vmem:[%s433_s5 + $0x18] sm:$0xff]  }
   0x4   :  { %304 = vmatpush3.bf16.msra.mxu1 %v329_v5  ;;  %315 = vmatprep.subr.bf16.mxu0 %v341_v0  ;;  %v333_v9 = vld [vmem:[%s433_s5] sm:$0xff]  }
   0x5   :  { %305 = vmatprep.subr.bf16.mxu1 %v341_v0  ;;  %v271_v11 = vld [vmem:[%s434_s2] ss:$0 sm:$0xff] }
   0x6   :  { %300 = vmatmul.mubr.msk.bf16.vlgmr.msra.gmra.mrb[0].mxu0 %vm37_vm2, %v28_v4  ;;  %v273_v21 = vld [vmem:[%s435_s4] ss:$0 sm:$0xff] }
   0x7   :  { %323 = vmatprep.mubr.msk.bf16.mxu0 %vm342_vm1, %v341_v0  ;;  %316 = vmatpush3.bf16.msra.mxu0 %v333_v9  ;;  %v279_v29 = vld [vmem:[%s436_s6] ss:$0 sm:$0xff] }
   0x8   :  { %306 = vmatpush3.bf16.msra.mxu1 %v330_v6  ;;  %317 = vmatprep.subr.bf16.mxu0 %v341_v0 }
   0x9   :  { %307 = vmatprep.subr.bf16.mxu1 %v341_v0 }
   0xb   :  { %318 = vmatpush3.bf16.msra.mxu0 %v334_v10 }
   0xc   :  { %308 = vmatpush3.bf16.msra.mxu1 %v331_v7  ;;  %319 = vmatprep.subr.bf16.mxu0 %v341_v0 }
   0xd   :  { %309 = vmatprep.subr.bf16.mxu1 %v341_v0 }
   0xf   :  { %320 = vmatpush3.bf16.msra.mxu0 %v335_v19 }
  0x10   :  { %310 = vmatpush3.bf16.msra.mxu1 %v332_v8  ;;  %321 = vmatprep.subr.bf16.mxu0 %v341_v0 }
  0x13   :  { %322 = vmatpush3.bf16.msra.mxu0 %v336_v20 }
  0xd9   :  { %v79_v12 = vpop.f32.mrb[0].mxu0 }
  0xda   :  { %v80_v13 = vadd.f32 %v271_v11, %v79_v12  ;;  %v301_v14 = vpop.f32.mrb[1].mxu0 }
  0xdb   :  { %v82_v15 = vpop.f32.mrb[2].mxu0 }
  0xdc   :  { %v85_v16 = vmax.f32 %v80_v13, 0.0  ;;  %v302_v17 = vpop.f32.mrb[3].mxu0 }
  0xde   :  { %v86_v18 = vpack.c.bf16 %v85_v16, %v85_v16 }
  0xe0   :  { %312 = vmatmul.mubr.msk.bf16.vlgmr.msra.gmra.mrb[0].mxu1 %vm126_vm3, %v86_v18 }
 0x1b3   :  { %v164_v22 = vpop.f32.mrb[0].mxu1 }
 0x1b4   :  { %v165_v23 = vadd.f32 %v273_v21, %v164_v22  ;;  %v313_v24 = vpop.f32.mrb[1].mxu1 }
 0x1b5   :  { %v167_v25 = vpop.f32.mrb[2].mxu1 }
 0x1b6   :  { %v170_v26 = vmax.f32 %v165_v23, 0.0  ;;  %v314_v27 = vpop.f32.mrb[3].mxu1 }
 0x1b8   :  { %v171_v28 = vpack.c.bf16 %v170_v26, %v170_v26 }
 0x1ba   :  { %324 = vmatmul.mubr.msk.bf16.vlgmr.msra.gmra.mrb[4].mxu0 %vm126_vm3, %v171_v28 }
 0x28d   :  { %v248_v30 = vpop.f32.mrb[4].mxu0 }
 0x28e   :  { %v249_v31 = vadd.f32 %v279_v29, %v248_v30  ;;  %v325_v32 = vpop.f32.mrb[5].mxu0 }
 0x28f   :  { %v251_v33 = vpop.f32.mrb[6].mxu0 }
 0x290   :  { %v326_v34 = vpop.f32.mrb[7].mxu0  ;;  %v255_v35 = vsel %vm254_vm4, %v249_v31, -inf }
 0x291   :  { %256 = vmax.xlane.f32.xlu0 %v255_v35 }
 0x31e   :  { %v257_v36 = vpop.xlane.xlu0 %256 }
 0x31f   :  { %v258_v37 = vsub.f32 %v249_v31, %v257_v36 }
 0x321   :  { %v259_v38 = vmul.f32 1.442695, %v258_v37 }
 0x323   :  { %337 = vpow2.f32 %v259_v38 }
 0x32d   :  { %v338_v39 = vpop.eup %337 }
 0x32e   :  { %v261_v40 = vsel %vm254_vm4, %v338_v39, 0.0 }
 0x32f   :  { %262 = vadd.xlane.f32.xlu0 %v261_v40 }
 0x3bc   :  { %v263_v41 = vpop.xlane.xlu0 %262 }
 0x3bd   :  { %339 = vrcp.f32 %v263_v41 }
 0x3c7   :  { %v340_v42 = vpop.eup %339 }
 0x3c8   :  { %v265_v43 = vmul.f32 %v340_v42, %v338_v39 }
 0x3ca   :  { %266 = vst.msk [vmem:[%s437_s7] sm:$0xff] %vm254_vm4, %v265_v43 }

</bundles_post_ra>
